<compile_context>
chip_gen: v6e
topology: v6e:2x2x1
jax: 0.10.0
libtpu: 0.0.40
codegen_flags: <defaults>
</compile_context>

<pallas_src>
import functools

import jax
import jax.numpy as jnp
import numpy as np
from jax.experimental import pallas as pl
from jax.experimental.pallas import tpu as pltpu


# ---------------------------------------------------------------------------
# Kernel A: fused projection -> head-major features (+ ones column) and the
# per-head attention-logit projections, all from two MXU matmuls.
# ---------------------------------------------------------------------------
def gat_project_kernel(x_ref, wh_ref, wa_ref, hd_ref, alphas_ref, *, heads, feat):
    H, F = heads, feat
    tm = x_ref.shape[0]
    # TODO(synk): cast matmul operands to bf16 on v6e/v7x if the accuracy budget allows.
    y = jnp.dot(x_ref[...], wh_ref[...], preferred_element_type=jnp.float32)   # [tm, H*F]
    alphas_ref[...] = jnp.dot(x_ref[...], wa_ref[...],
                              preferred_element_type=jnp.float32)              # [tm, 2H]
    # Head-major relayout done here (rides the XLU slot under the MXU) so the
    # wrapper needs no full-size XLA transpose of the projected features.
    for h in range(H):
        hd_ref[h, :, :F] = y[:, h * F:(h + 1) * F]
    # Ones column: Kernel B's einsum then accumulates the softmax denominator
    # in its last output column for free.
    hd_ref[:, :, F:F + 1] = jnp.ones((H, tm, 1), jnp.float32)


# ---------------------------------------------------------------------------
# Kernel B: block-sparse tiled masked segment softmax + neighbour aggregation.
# ---------------------------------------------------------------------------
def gat_attention_kernel(cols_ref, cnts_ref,      # SMEM prefetch: block-sparse schedule
                         al_ref,                  # [H, ti, 1]   src logits
                         ar_ref,                  # [H, 1, tj]   dst logits (lane-major)
                         hd_ref,                  # [H, N, F+1] resident or [H, tj, F+1] streamed
                         adj_ref,                 # [ti, tj] int8 dense edge-mask tile
                         out_ref,                 # [ti, H*F]    lane-dense output
                         m_scr, acc_scr,          # [H, ti, 1], [H, ti, F+1]
                         *, heads, feat, tile_cols, cols_per_row, h_resident):
    i = pl.program_id(0)
    j = pl.program_id(1)
    H, F = heads, feat
    NEG = jnp.float32(-1e30)      # mask fill for non-edges
    FLOOR = jnp.float32(-1e20)    # finite floor for the running max

    @pl.when(j == 0)
    def _init():
        m_scr[...] = jnp.full_like(m_scr, FLOOR)
        acc_scr[...] = jnp.zeros_like(acc_scr)

    # Only occupied column tiles are scheduled for this row tile; the padded
    # tail steps (j >= count) repeat the previous block index (no DMA) and skip
    # all compute.
    @pl.when(j < cnts_ref[i])
    def _compute():
        if h_resident:
            jb = cols_ref[i * cols_per_row + j]
            start = pl.multiple_of(jb * tile_cols, tile_cols)
            hd = hd_ref[:, pl.ds(start, tile_cols), :]            # [H, tj, F+1]
        else:
            hd = hd_ref[...]                                      # [H, tj, F+1]

        # e[h, r, c] = LeakyReLU(alpha_l[h, r] + alpha_r[h, c], 0.2); alpha_r is
        # already lane-major so no in-kernel transpose is needed.
        e = al_ref[...] + ar_ref[...]                             # [H, ti, tj]
        e = jnp.where(e > 0, e, jnp.float32(0.2) * e)
        mask = (adj_ref[...] > 0)[None, :, :]                     # [1, ti, tj]
        e = jnp.where(mask, e, NEG)

        m_prev = m_scr[...]
        m_new = jnp.maximum(m_prev, jnp.max(e, axis=2, keepdims=True))
        # m_prev >= FLOOR always, so m_new is finite and exp(NEG - m_new)
        # underflows to exactly 0 -> no second mask select over [H, ti, tj].
        scale = jnp.exp(m_prev - m_new)
        p = jnp.exp(e - m_new)                                    # [H, ti, tj]
        # hd's last column is 1.0, so this single MXU einsum also accumulates
        # the softmax denominator in acc[:, :, F] (no XLU row-sum).
        # TODO(synk): cast p/hd to bf16 on v6e/v7x if the accuracy budget allows.
        acc_scr[...] = scale * acc_scr[...] + jnp.einsum(
            'hrc,hcf->hrf', p, hd, preferred_element_type=jnp.float32)
        m_scr[...] = m_new

    @pl.when(j == pl.num_programs(1) - 1)
    def _finalize():
        denom = acc_scr[:, :, F:F + 1]                            # [H, ti, 1]
        # TODO(synk): isolated source nodes produce a zero row here; the
        # PyTorch / edge-list reference yields NaN for an empty softmax segment.
        denom = jnp.where(denom == 0.0, jnp.float32(1.0), denom)
        res = acc_scr[:, :, :F] * pl.reciprocal(denom, approx=False)   # [H, ti, F]
        # Lane-dense [ti, H*F] (=128 lanes) -> unmasked stores, no wrapper
        # transpose of the output.
        out_ref[...] = jnp.concatenate([res[h] for h in range(H)], axis=1)


# ---------------------------------------------------------------------------
# Parameter / graph plumbing (done once, outside the per-forward path)
# ---------------------------------------------------------------------------
def pack_params(W_all, a_all):
    """W_all: [H, Fout, Fin]; a_all: [H, 1, 2*Fout].
    Returns Wh [Fin, H*Fout] (head-major columns) and Wa [Fin, 2H]
    (= [W.T a_l | W.T a_r] per head) so Kernel A needs only two matmuls."""
    H, Fout, Fin = W_all.shape
    Wh = jnp.transpose(W_all, (2, 0, 1)).reshape(Fin, H * Fout)
    a_l = a_all[:, 0, :Fout]                              # [H, Fout]
    a_r = a_all[:, 0, Fout:]                              # [H, Fout]
    W_al = jnp.einsum('hoi,ho->ih', W_all, a_l)           # [Fin, H]
    W_ar = jnp.einsum('hoi,ho->ih', W_all, a_r)           # [Fin, H]
    return Wh, jnp.concatenate([W_al, W_ar], axis=1)


def build_graph_tensors(edge_index, num_nodes, tile_rows, tile_cols):
    """Dense int8 adjacency (adj[src, dst] = 1) plus the block-sparse schedule:
    per row tile, the occupied column-tile indices (padded with the last valid
    entry so padded grid steps re-use the previous DMA) and their count.
    Built once per graph on the host, hoisted out of the forward path.
    TODO(synk): duplicate edges in edge_index collapse in the dense mask; the
    edge lists used here are unique so semantics match the edge-list form."""
    src = np.asarray(edge_index[0])
    dst = np.asarray(edge_index[1])
    adj = np.zeros((num_nodes, num_nodes), np.int8)
    adj[src, dst] = 1
    ni = num_nodes // tile_rows
    nj = num_nodes // tile_cols
    occ = adj.astype(np.int32).reshape(ni, tile_rows, nj, tile_cols).sum(axis=(1, 3)) > 0
    cnts = occ.sum(axis=1).astype(np.int32)               # [ni]
    njm = max(1, int(cnts.max()))
    cols = np.zeros((ni, njm), np.int32)
    for r in range(ni):
        idx = np.nonzero(occ[r])[0]
        if idx.size:
            cols[r, :idx.size] = idx
            cols[r, idx.size:] = idx[-1]
    return (jnp.asarray(adj), jnp.asarray(cols.reshape(-1)),
            jnp.asarray(cnts), njm)


# ---------------------------------------------------------------------------
# Layer forward
# ---------------------------------------------------------------------------
def vanilla_gat_layer(x, Wh, Wa, adj_i8, block_cols, block_cnts, cols_per_row,
                      *, heads, out_features, concat=False,
                      tile_rows=None, tile_cols=None, tile_m=None,
                      h_resident=None):
    N, Fin = x.shape
    H, F = heads, out_features
    assert Wh.shape == (Fin, H * F) and Wa.shape == (Fin, 2 * H)

    tm = tile_m or min(512, N)        # Kernel A is DMA/overhead bound -> large row tiles
    ti = tile_rows or min(128, N)     # keep ni >= 2 where possible (v7x megacore)
    tj = tile_cols or min(256, N)
    assert N % tm == 0 and N % ti == 0 and N % tj == 0, "tile sizes must divide N"
    assert (tj % 128 == 0) or (tj == N), "tj must be a lane multiple or the full N"
    assert ti % 8 == 0 and tm % 8 == 0
    ni, nj = N // ti, N // tj
    assert adj_i8.shape == (N, N)
    assert block_cnts.shape == (ni,) and block_cols.shape == (ni * cols_per_row,)

    # --- Kernel A: fused projection, head-major outputs ----------------------
    hd, alphas = pl.pallas_call(
        functools.partial(gat_project_kernel, heads=H, feat=F),
        out_shape=(jax.ShapeDtypeStruct((H, N, F + 1), jnp.float32),
                   jax.ShapeDtypeStruct((N, 2 * H), jnp.float32)),
        grid=(N // tm,),
        in_specs=[pl.BlockSpec((tm, Fin), lambda i: (i, 0)),
                  pl.BlockSpec((Fin, H * F), lambda i: (0, 0)),     # resident weights
                  pl.BlockSpec((Fin, 2 * H), lambda i: (0, 0))],    # resident weights
        out_specs=[pl.BlockSpec((H, tm, F + 1), lambda i: (0, i, 0)),
                   pl.BlockSpec((tm, 2 * H), lambda i: (i, 0))],
        compiler_params=pltpu.CompilerParams(
            dimension_semantics=("parallel",),
            vmem_limit_bytes=32 * 1024 * 1024),
    )(x, Wh, Wa)

    # Tiny (2H-column) layout plumbing; the large H*F feature relayout already
    # happened inside Kernel A so no full-size HBM round trip remains.
    # TODO(synk): emit these two head-major views directly from Kernel A too.
    al3 = alphas[:, :H].T[:, :, None]          # [H, N, 1]
    ar3 = alphas[:, H:].T[:, None, :]          # [H, 1, N]  lane-major dst logits

    # Keep hd resident in VMEM across all row tiles when its lane-padded size
    # (F+1 -> one 128-lane tile) fits comfortably; otherwise stream per block.
    if h_resident is None:
        h_resident = (H * N * 128 * 4) <= 8 * 1024 * 1024
    cpr = cols_per_row

    if h_resident:
        hd_spec = pl.BlockSpec((H, N, F + 1), lambda i, j, cols, cnts: (0, 0, 0))
    else:
        hd_spec = pl.BlockSpec((H, tj, F + 1),
                               lambda i, j, cols, cnts: (0, cols[i * cpr + j], 0))

    # TODO(synk): consider pipeline_mode=pl.Buffered(3) on the adj/ar streams and
    # a lane-major running-max scratch if profiling shows exposed DMA / padding.
    grid_spec = pltpu.PrefetchScalarGridSpec(
        num_scalar_prefetch=2,                  # block_cols, block_cnts -> SMEM
        grid=(ni, cpr),                         # block-sparse: occupied col tiles only
        in_specs=[
            pl.BlockSpec((H, ti, 1), lambda i, j, cols, cnts: (0, i, 0)),        # alpha_l
            pl.BlockSpec((H, 1, tj), lambda i, j, cols, cnts: (0, 0, cols[i * cpr + j])),
            hd_spec,                                                              # features
            pl.BlockSpec((ti, tj), lambda i, j, cols, cnts: (i, cols[i * cpr + j])),
        ],
        out_specs=pl.BlockSpec((ti, H * F), lambda i, j, cols, cnts: (i, 0)),
        scratch_shapes=[pltpu.VMEM((H, ti, 1), jnp.float32),        # running max
                        pltpu.VMEM((H, ti, F + 1), jnp.float32)],   # feat accum + denom
    )

    out = pl.pallas_call(
        functools.partial(gat_attention_kernel, heads=H, feat=F, tile_cols=tj,
                          cols_per_row=cpr, h_resident=h_resident),
        out_shape=jax.ShapeDtypeStruct((N, H * F), jnp.float32),
        grid_spec=grid_spec,
        compiler_params=pltpu.CompilerParams(
            dimension_semantics=("parallel", "arbitrary"),
            vmem_limit_bytes=32 * 1024 * 1024),
    )(block_cols, block_cnts, al3, ar3, hd, adj_i8)

    if concat:
        return out                                   # [N, H*F], head-major columns
    return out.reshape(N, H, F).mean(axis=1)         # mean over heads


# ---------------------------------------------------------------------------
# Pure-JAX edge-list reference (mirrors the PyTorch forward exactly)
# ---------------------------------------------------------------------------
def gat_head_reference(x, W, a, edge_index):
    N = x.shape[0]
    Fout = W.shape[0]
    h = x @ W.T
    src, dst = edge_index[0], edge_index[1]
    a_l = a[0, :Fout]
    a_r = a[0, Fout:]
    e = h[src] @ a_l + h[dst] @ a_r
    e = jnp.where(e > 0, e, 0.2 * e)                    # LeakyReLU(0.2)
    e_max = jax.ops.segment_max(e, src, num_segments=N)
    e_exp = jnp.exp(e - e_max[src])
    denom = jax.ops.segment_sum(e_exp, src, num_segments=N)
    attn = e_exp / denom[src]
    return jax.ops.segment_sum(attn[:, None] * h[dst], src, num_segments=N)


def vanilla_gat_layer_reference(x, W_all, a_all, edge_index, concat=False):
    outs = [gat_head_reference(x, W_all[h], a_all[h], edge_index)
            for h in range(W_all.shape[0])]
    if concat:
        return jnp.concatenate(outs, axis=1)
    return jnp.mean(jnp.stack(outs, axis=0), axis=0)


if __name__ == "__main__":
    N, Fin, Fout, H = 64, 32, 16, 8            # H * Fout = 128 -> lane-dense output

    key = jax.random.PRNGKey(0)
    kx, kw, ka = jax.random.split(key, 3)

    x = jax.random.normal(kx, (N, Fin), dtype=jnp.float32)
    bw = 1.0 / (Fin ** 0.5)
    W_all = jax.random.uniform(kw, (H, Fout, Fin), jnp.float32, -bw, bw)
    ba = 1.0 / ((2 * Fout) ** 0.5)
    a_all = jax.random.uniform(ka, (H, 1, 2 * Fout), jnp.float32, -ba, ba)

    # Deterministic unique edge list: self-loop + two ring neighbours per node.
    idx = jnp.arange(N, dtype=jnp.int32)
    src = jnp.concatenate([idx, idx, idx])
    dst = jnp.concatenate([idx, (idx + 1) % N, (idx + 5) % N])
    edge_index = jnp.stack([src, dst], axis=0)          # [2, E], E = 192

    ti, tj = 32, 64       # ni = 2 (two row tiles for v7x megacore), tj = N (full lanes)

    # Hoisted out of the per-forward path: packed parameters, int8 adjacency and
    # the block-sparse schedule are built once per graph and reused.
    Wh, Wa = pack_params(W_all, a_all)
    adj_i8, block_cols, block_cnts, cpr = build_graph_tensors(edge_index, N, ti, tj)

    out_mean = vanilla_gat_layer(x, Wh, Wa, adj_i8, block_cols, block_cnts, cpr,
                                 heads=H, out_features=Fout, concat=False,
                                 tile_rows=ti, tile_cols=tj)
    out_cat = vanilla_gat_layer(x, Wh, Wa, adj_i8, block_cols, block_cnts, cpr,
                                heads=H, out_features=Fout, concat=True,
                                tile_rows=ti, tile_cols=tj)
    out_mean, out_cat = jax.block_until_ready((out_mean, out_cat))

    ref_mean = vanilla_gat_layer_reference(x, W_all, a_all, edge_index, concat=False)
    ref_cat = vanilla_gat_layer_reference(x, W_all, a_all, edge_index, concat=True)

    assert out_mean.shape == (N, Fout)
    assert out_cat.shape == (N, H * Fout)
    err_m = jnp.max(jnp.abs(out_mean - ref_mean))
    err_c = jnp.max(jnp.abs(out_cat - ref_cat))
    assert jnp.allclose(out_mean, ref_mean, rtol=1e-4, atol=1e-4), f"mean max abs err {err_m}"
    assert jnp.allclose(out_cat, ref_cat, rtol=1e-4, atol=1e-4), f"concat max abs err {err_c}"
    print("KERNEL_OK")
</pallas_src>

<mosaic_0001>
module attributes {stable_mosaic.version = 11 : i64} {
  func.func @gat_project_kernel(%arg0: i32, %arg1: memref<64x32xf32, #tpu.memory_space<vmem>>, %arg2: memref<32x128xf32, #tpu.memory_space<vmem>>, %arg3: memref<32x16xf32, #tpu.memory_space<vmem>>, %arg4: memref<8x64x17xf32, #tpu.memory_space<vmem>>, %arg5: memref<64x16xf32, #tpu.memory_space<vmem>>) attributes {dimension_semantics = [#tpu.dimension_semantics<parallel>], iteration_bounds = array<i64: 1>, scalar_prefetch = 0 : i64, scratch_operands = 0 : i64, tpu.core_type = #tpu.core_type<tc>, window_params = [{transform_indices = @transform_0, window_bounds = array<i64: 64, 32>}, {pipeline_mode = #tpu.pipeline_mode<synchronous>, transform_indices = @transform_1, window_bounds = array<i64: 32, 128>}, {pipeline_mode = #tpu.pipeline_mode<synchronous>, transform_indices = @transform_2, window_bounds = array<i64: 32, 16>}, {transform_indices = @transform_3, window_bounds = array<i64: 8, 64, 17>}, {transform_indices = @transform_4, window_bounds = array<i64: 64, 16>}]} {
    %c0 = arith.constant 0 : index
    %c0_0 = arith.constant 0 : index
    %0 = vector.load %arg1[%c0, %c0_0] : memref<64x32xf32, #tpu.memory_space<vmem>>, vector<64x32xf32>
    %c0_1 = arith.constant 0 : index
    %c0_2 = arith.constant 0 : index
    %1 = vector.load %arg2[%c0_1, %c0_2] : memref<32x128xf32, #tpu.memory_space<vmem>>, vector<32x128xf32>
    %cst = arith.constant dense<0.000000e+00> : vector<64x128xf32>
    %2 = tpu.matmul %0, %1, %cst {dimension_numbers = #tpu.dot_dimension_numbers<[1], [0], [0], [1], [0, 0, 1, 1], [], []>} : vector<64x32xf32>, vector<32x128xf32>, vector<64x128xf32> -> vector<64x128xf32>
    %c0_3 = arith.constant 0 : index
    %c0_4 = arith.constant 0 : index
    %3 = vector.load %arg1[%c0_3, %c0_4] : memref<64x32xf32, #tpu.memory_space<vmem>>, vector<64x32xf32>
    %c0_5 = arith.constant 0 : index
    %c0_6 = arith.constant 0 : index
    %4 = vector.load %arg3[%c0_5, %c0_6] : memref<32x16xf32, #tpu.memory_space<vmem>>, vector<32x16xf32>
    %cst_7 = arith.constant dense<0.000000e+00> : vector<64x16xf32>
    %5 = tpu.matmul %3, %4, %cst_7 {dimension_numbers = #tpu.dot_dimension_numbers<[1], [0], [0], [1], [0, 0, 1, 1], [], []>} : vector<64x32xf32>, vector<32x16xf32>, vector<64x16xf32> -> vector<64x16xf32>
    %c0_8 = arith.constant 0 : index
    %c0_9 = arith.constant 0 : index
    %6 = vector.load %arg5[%c0_8, %c0_9] : memref<64x16xf32, #tpu.memory_space<vmem>>, vector<64x16xf32>
    tpu.vector_store %arg5[%c0_8, %c0_9], %5 {strides = array<i32>} : memref<64x16xf32, #tpu.memory_space<vmem>>, vector<64x16xf32>,
    %7 = vector.extract_strided_slice %2 {offsets = [0, 0], sizes = [64, 16], strides = [1, 1]} : vector<64x128xf32> to vector<64x16xf32>
    %c0_10 = arith.constant 0 : index
    %c0_11 = arith.constant 0 : index
    %c0_12 = arith.constant 0 : index
    %8 = vector.load %arg4[%c0_10, %c0_11, %c0_12] : memref<8x64x17xf32, #tpu.memory_space<vmem>>, vector<1x64x16xf32>
    %9 = vector.shape_cast %8 : vector<1x64x16xf32> to vector<64x16xf32>
    %10 = vector.shape_cast %7 : vector<64x16xf32> to vector<1x64x16xf32>
    tpu.vector_store %arg4[%c0_10, %c0_11, %c0_12], %10 {strides = array<i32>} : memref<8x64x17xf32, #tpu.memory_space<vmem>>, vector<1x64x16xf32>,
    %11 = vector.extract_strided_slice %2 {offsets = [0, 16], sizes = [64, 16], strides = [1, 1]} : vector<64x128xf32> to vector<64x16xf32>
    %c1 = arith.constant 1 : index
    %c0_13 = arith.constant 0 : index
    %c0_14 = arith.constant 0 : index
    %12 = vector.load %arg4[%c1, %c0_13, %c0_14] : memref<8x64x17xf32, #tpu.memory_space<vmem>>, vector<1x64x16xf32>
    %13 = vector.shape_cast %12 : vector<1x64x16xf32> to vector<64x16xf32>
    %14 = vector.shape_cast %11 : vector<64x16xf32> to vector<1x64x16xf32>
    tpu.vector_store %arg4[%c1, %c0_13, %c0_14], %14 {strides = array<i32>} : memref<8x64x17xf32, #tpu.memory_space<vmem>>, vector<1x64x16xf32>,
    %15 = vector.extract_strided_slice %2 {offsets = [0, 32], sizes = [64, 16], strides = [1, 1]} : vector<64x128xf32> to vector<64x16xf32>
    %c2 = arith.constant 2 : index
    %c0_15 = arith.constant 0 : index
    %c0_16 = arith.constant 0 : index
    %16 = vector.load %arg4[%c2, %c0_15, %c0_16] : memref<8x64x17xf32, #tpu.memory_space<vmem>>, vector<1x64x16xf32>
    %17 = vector.shape_cast %16 : vector<1x64x16xf32> to vector<64x16xf32>
    %18 = vector.shape_cast %15 : vector<64x16xf32> to vector<1x64x16xf32>
    tpu.vector_store %arg4[%c2, %c0_15, %c0_16], %18 {strides = array<i32>} : memref<8x64x17xf32, #tpu.memory_space<vmem>>, vector<1x64x16xf32>,
    %19 = vector.extract_strided_slice %2 {offsets = [0, 48], sizes = [64, 16], strides = [1, 1]} : vector<64x128xf32> to vector<64x16xf32>
    %c3 = arith.constant 3 : index
    %c0_17 = arith.constant 0 : index
    %c0_18 = arith.constant 0 : index
    %20 = vector.load %arg4[%c3, %c0_17, %c0_18] : memref<8x64x17xf32, #tpu.memory_space<vmem>>, vector<1x64x16xf32>
    %21 = vector.shape_cast %20 : vector<1x64x16xf32> to vector<64x16xf32>
    %22 = vector.shape_cast %19 : vector<64x16xf32> to vector<1x64x16xf32>
    tpu.vector_store %arg4[%c3, %c0_17, %c0_18], %22 {strides = array<i32>} : memref<8x64x17xf32, #tpu.memory_space<vmem>>, vector<1x64x16xf32>,
    %23 = vector.extract_strided_slice %2 {offsets = [0, 64], sizes = [64, 16], strides = [1, 1]} : vector<64x128xf32> to vector<64x16xf32>
    %c4 = arith.constant 4 : index
    %c0_19 = arith.constant 0 : index
    %c0_20 = arith.constant 0 : index
    %24 = vector.load %arg4[%c4, %c0_19, %c0_20] : memref<8x64x17xf32, #tpu.memory_space<vmem>>, vector<1x64x16xf32>
    %25 = vector.shape_cast %24 : vector<1x64x16xf32> to vector<64x16xf32>
    %26 = vector.shape_cast %23 : vector<64x16xf32> to vector<1x64x16xf32>
    tpu.vector_store %arg4[%c4, %c0_19, %c0_20], %26 {strides = array<i32>} : memref<8x64x17xf32, #tpu.memory_space<vmem>>, vector<1x64x16xf32>,
    %27 = vector.extract_strided_slice %2 {offsets = [0, 80], sizes = [64, 16], strides = [1, 1]} : vector<64x128xf32> to vector<64x16xf32>
    %c5 = arith.constant 5 : index
    %c0_21 = arith.constant 0 : index
    %c0_22 = arith.constant 0 : index
    %28 = vector.load %arg4[%c5, %c0_21, %c0_22] : memref<8x64x17xf32, #tpu.memory_space<vmem>>, vector<1x64x16xf32>
    %29 = vector.shape_cast %28 : vector<1x64x16xf32> to vector<64x16xf32>
    %30 = vector.shape_cast %27 : vector<64x16xf32> to vector<1x64x16xf32>
    tpu.vector_store %arg4[%c5, %c0_21, %c0_22], %30 {strides = array<i32>} : memref<8x64x17xf32, #tpu.memory_space<vmem>>, vector<1x64x16xf32>,
    %31 = vector.extract_strided_slice %2 {offsets = [0, 96], sizes = [64, 16], strides = [1, 1]} : vector<64x128xf32> to vector<64x16xf32>
    %c6 = arith.constant 6 : index
    %c0_23 = arith.constant 0 : index
    %c0_24 = arith.constant 0 : index
    %32 = vector.load %arg4[%c6, %c0_23, %c0_24] : memref<8x64x17xf32, #tpu.memory_space<vmem>>, vector<1x64x16xf32>
    %33 = vector.shape_cast %32 : vector<1x64x16xf32> to vector<64x16xf32>
    %34 = vector.shape_cast %31 : vector<64x16xf32> to vector<1x64x16xf32>
    tpu.vector_store %arg4[%c6, %c0_23, %c0_24], %34 {strides = array<i32>} : memref<8x64x17xf32, #tpu.memory_space<vmem>>, vector<1x64x16xf32>,
    %35 = vector.extract_strided_slice %2 {offsets = [0, 112], sizes = [64, 16], strides = [1, 1]} : vector<64x128xf32> to vector<64x16xf32>
    %c7 = arith.constant 7 : index
    %c0_25 = arith.constant 0 : index
    %c0_26 = arith.constant 0 : index
    %36 = vector.load %arg4[%c7, %c0_25, %c0_26] : memref<8x64x17xf32, #tpu.memory_space<vmem>>, vector<1x64x16xf32>
    %37 = vector.shape_cast %36 : vector<1x64x16xf32> to vector<64x16xf32>
    %38 = vector.shape_cast %35 : vector<64x16xf32> to vector<1x64x16xf32>
    tpu.vector_store %arg4[%c7, %c0_25, %c0_26], %38 {strides = array<i32>} : memref<8x64x17xf32, #tpu.memory_space<vmem>>, vector<1x64x16xf32>,
    %cst_27 = arith.constant 1.000000e+00 : f32
    %39 = vector.broadcast %cst_27 : f32 to vector<8x64x1xf32>
    %c0_28 = arith.constant 0 : index
    %c0_29 = arith.constant 0 : index
    %c16 = arith.constant 16 : index
    %40 = vector.load %arg4[%c0_28, %c0_29, %c16] : memref<8x64x17xf32, #tpu.memory_space<vmem>>, vector<8x64x1xf32>
    tpu.vector_store %arg4[%c0_28, %c0_29, %c16], %39 {strides = array<i32>} : memref<8x64x17xf32, #tpu.memory_space<vmem>>, vector<8x64x1xf32>,
    return
  }
  func.func @transform_0(%arg0: i32) -> (i32, i32) {
    %c0_i32 = arith.constant 0 : i32
    %c0_i32_0 = arith.constant 0 : i32
    return %arg0, %c0_i32 : i32, i32
  }
  func.func @transform_1(%arg0: i32) -> (i32, i32) {
    %c0_i32 = arith.constant 0 : i32
    %c0_i32_0 = arith.constant 0 : i32
    %c0_i32_1 = arith.constant 0 : i32
    return %c0_i32, %c0_i32_0 : i32, i32
  }
  func.func @transform_2(%arg0: i32) -> (i32, i32) {
    %c0_i32 = arith.constant 0 : i32
    %c0_i32_0 = arith.constant 0 : i32
    %c0_i32_1 = arith.constant 0 : i32
    return %c0_i32, %c0_i32_0 : i32, i32
  }
  func.func @transform_3(%arg0: i32) -> (i32, i32, i32) {
    %c0_i32 = arith.constant 0 : i32
    %c0_i32_0 = arith.constant 0 : i32
    %c0_i32_1 = arith.constant 0 : i32
    return %c0_i32, %arg0, %c0_i32_0 : i32, i32, i32
  }
  func.func @transform_4(%arg0: i32) -> (i32, i32) {
    %c0_i32 = arith.constant 0 : i32
    %c0_i32_0 = arith.constant 0 : i32
    return %arg0, %c0_i32 : i32, i32
  }
}

</mosaic_0001>

<bundles_post_ra>
// kernel: tpu_custom_call.1
= control target key start
LH: loop header
LB: loop body
LE: loop exit
PB: predicated region body
PF: predicated region fallthrough
CT: control target
= control target key end

     0   :  { %vm28_vm0 = vcmask 261120   ;;  %vm267_vm1 = vcmask 130048   ;;  %vm523_vm2 = vcmask 138368   ;;  %s740_s20 = smov 96   ;;  %s741_s21 = smov 112   ;;  %v742_v17 = vmov 1.0   ;;  %s1521_s1 = inlined_call_operand.vmem [shape: f32[32,128], index: 1, kind: input, shape index: {}]   ;;  %s1522_s0 = inlined_call_operand.vmem [shape: f32[64,32], index: 0, kind: input, shape index: {}]   ;;  %s1523_s2 = inlined_call_operand.vmem [shape: f32[32,16], index: 2, kind: input, shape index: {}]   ;;  %s1524_s3 = inlined_call_operand.vmem [shape: f32[8,64,17], index: 3, kind: output, shape index: {0}]   ;;  %s1525_s4 = inlined_call_operand.vmem [shape: f32[64,16], index: 4, kind: output, shape index: {1}]  }
   0x1   :  { %v27_v0 = vld [vmem:[%s1521_s1 + $0x18] sm:$0xff]  ;;  %v26_v1 = vld [vmem:[%s1521_s1 + $0x10] sm:$0xff]  ;;  %v16_v2 = vld [vmem:[%s1522_s0] sm:$0xff]  ;;  %s743_s28 = smov 80   ;;  %s744_s10 = smov 64  }
   0x2   :  { %692 = vmatprep.subr.mxu0 %v27_v0  ;;  %v25_v3 = vld [vmem:[%s1521_s1 + $0x8] sm:$0xff]  ;;  %700 = vmatprep.mubr.msk.f32.mxu0 %vm28_vm0, %v16_v2  ;;  %v24_v4 = vld [vmem:[%s1521_s1] sm:$0xff]  ;;  %v18_v6 = vld [vmem:[%s1522_s0 + $0x10] sm:$0xff]  ;;  %s745_s18 = smov 48   ;;  %s746_s29 = smov 32  }
   0x3   :  { %693 = vmatpush3.msra.mxu0 %v27_v0  ;;  %720 = vmatprep.mubr.msk.f32.mxu1 %vm28_vm0, %v16_v2  ;;  %v17_v5 = vld [vmem:[%s1522_s0 + $0x8] sm:$0xff]  ;;  %v19_v7 = vld [vmem:[%s1522_s0 + $0x18] sm:$0xff]  ;;  %v20_v8 = vld [vmem:[%s1522_s0 + $0x20] sm:$0xff]  ;;  %s747_s30 = smov 16  }
   0x4   :  { %694 = vmatprep.subr.mxu0 %v26_v1  ;;  %v21_v9 = vld [vmem:[%s1522_s0 + $0x28] sm:$0xff]  ;;  %v22_v10 = vld [vmem:[%s1522_s0 + $0x30] sm:$0xff]  ;;  %v23_v11 = vld [vmem:[%s1522_s0 + $0x38] sm:$0xff] }
   0x5   :  { %695 = vmatpush3.msra.mxu0 %v26_v1  ;;  %v161_v12 = vld [vmem:[%s1523_s2 + $0x18] sm:$0xff]  ;;  %v160_v13 = vld [vmem:[%s1523_s2 + $0x10] sm:$0xff]  ;;  %v159_v14 = vld [vmem:[%s1523_s2 + $0x8] sm:$0xff] }
   0x6   :  { %696 = vmatprep.subr.mxu0 %v25_v3  ;;  %712 = vmatprep.subr.mxu1 %v161_v12  ;;  %v158_v15 = vld [vmem:[%s1523_s2] sm:$0xff] }
   0x7   :  { %697 = vmatpush3.msra.mxu0 %v25_v3  ;;  %713 = vmatpush3.msra.mxu1 %v161_v12 }
   0x8   :  { %698 = vmatprep.subr.mxu0 %v24_v4  ;;  %714 = vmatprep.subr.mxu1 %v160_v13 }
   0x9   :  { %699 = vmatpush3.msra.mxu0 %v24_v4  ;;  %715 = vmatpush3.msra.mxu1 %v160_v13 }
   0xa   :  { %701 = vmatmul.mubr.msk.f32.vlgmr.msra.gmra.mxu0 %vm28_vm0, %v17_v5  ;;  %716 = vmatprep.subr.mxu1 %v159_v14 }
   0xb   :  { %703 = vmatprep.mubr.msk.f32.mxu0 %vm28_vm0, %v18_v6  ;;  %717 = vmatpush3.msra.mxu1 %v159_v14 }
   0xc   :  { %718 = vmatprep.subr.mxu1 %v158_v15 }
   0xd   :  { %719 = vmatpush3.msra.mxu1 %v158_v15 }
   0xe   :  { %704 = vmatmul.mubr.msk.f32.gmra.mxu0 %vm28_vm0, %v19_v7  ;;  %721 = vmatmul.mubr.msk.f32.vlgmr.msra.gmra.mxu1 %vm28_vm0, %v17_v5 }
   0xf   :  { %706 = vmatprep.mubr.msk.f32.mxu0 %vm28_vm0, %v20_v8  ;;  %723 = vmatprep.mubr.msk.f32.mxu1 %vm28_vm0, %v18_v6 }
  0x12   :  { %707 = vmatmul.mubr.msk.f32.gmra.mxu0 %vm28_vm0, %v21_v9  ;;  %724 = vmatmul.mubr.msk.f32.gmra.mxu1 %vm28_vm0, %v19_v7 }
  0x13   :  { %709 = vmatprep.mubr.msk.f32.mxu0 %vm28_vm0, %v22_v10  ;;  %726 = vmatprep.mubr.msk.f32.mxu1 %vm28_vm0, %v20_v8 }
  0x16   :  { %710 = vmatmul.mubr.msk.f32.gmra.mxu0 %vm28_vm0, %v23_v11  ;;  %727 = vmatmul.mubr.msk.f32.gmra.mxu1 %vm28_vm0, %v21_v9 }
  0x17   :  { %729 = vmatprep.mubr.msk.f32.mxu1 %vm28_vm0, %v22_v10 }
  0x1a   :  { %730 = vmatmul.mubr.msk.f32.gmra.mxu1 %vm28_vm0, %v23_v11 }
  0xca   :  { %v702_v16 = vpop.f32.mrf.mxu0 }
  0xcb   :  { %277 = vst.msk [vmem:[%s1524_s3 + $0x8] sm:$0xff] %vm267_vm1, %v702_v16  ;;  %327 = vrot.lane.b32.xlu1 %v702_v16, %s740_s20  ;;  %294 = vrot.lane.b32.xlu0 %v702_v16, %s741_s21 }
  0xcc   :  { %525 = vst.msk [vmem:[%s1524_s3 + $0x8] sm:$0xff] %vm523_vm2, %v742_v17  ;;  %v119_v18 = vpop.f32.mrf.mxu0 }
  0xcd   :  { %276 = vst.msk [vmem:[%s1524_s3] sm:$0xff] %vm267_vm1, %v119_v18 }
  0xce   :  { %524 = vst.msk [vmem:[%s1524_s3] sm:$0xff] %vm523_vm2, %v742_v17  ;;  %v705_v19 = vpop.f32.mrf.mxu0  ;;  %v722_v25 = vpop.f32.mrf.mxu1 }
  0xcf   :  { %360 = vrot.lane.b32.xlu1 %v702_v16, %s743_s28  ;;  %292 = vrot.lane.b32.xlu0 %v119_v18, %s741_s21  ;;  %279 = vst.msk [vmem:[%s1524_s3 + $0x18] sm:$0xff] %vm267_vm1, %v705_v19  ;;  %269 = vst.msk [vmem:[%s1525_s4 + $0x8] sm:$0xff] %vm267_vm1, %v722_v25 }
  0xd0   :  { %527 = vst.msk [vmem:[%s1524_s3 + $0x18] sm:$0xff] %vm523_vm2, %v742_v17  ;;  %v129_v20 = vpop.f32.mrf.mxu0  ;;  %v228_v26 = vpop.f32.mrf.mxu1 }
  0xd1   :  { %278 = vst.msk [vmem:[%s1524_s3 + $0x10] sm:$0xff] %vm267_vm1, %v129_v20  ;;  %268 = vst.msk [vmem:[%s1525_s4] sm:$0xff] %vm267_vm1, %v228_v26 }
  0xd2   :  { %526 = vst.msk [vmem:[%s1524_s3 + $0x10] sm:$0xff] %vm523_vm2, %v742_v17  ;;  %v708_v21 = vpop.f32.mrf.mxu0  ;;  %v725_v27 = vpop.f32.mrf.mxu1 }
  0xd3   :  { %393 = vrot.lane.b32.xlu1 %v702_v16, %s744_s10  ;;  %325 = vrot.lane.b32.xlu0 %v119_v18, %s740_s20  ;;  %281 = vst.msk [vmem:[%s1524_s3 + $0x28] sm:$0xff] %vm267_vm1, %v708_v21  ;;  %271 = vst.msk [vmem:[%s1525_s4 + $0x18] sm:$0xff] %vm267_vm1, %v725_v27 }
  0xd4   :  { %529 = vst.msk [vmem:[%s1524_s3 + $0x28] sm:$0xff] %vm523_vm2, %v742_v17  ;;  %v139_v22 = vpop.f32.mrf.mxu0  ;;  %v238_v28 = vpop.f32.mrf.mxu1 }
  0xd5   :  { %280 = vst.msk [vmem:[%s1524_s3 + $0x20] sm:$0xff] %vm267_vm1, %v139_v22  ;;  %270 = vst.msk [vmem:[%s1525_s4 + $0x10] sm:$0xff] %vm267_vm1, %v238_v28 }
  0xd6   :  { %528 = vst.msk [vmem:[%s1524_s3 + $0x20] sm:$0xff] %vm523_vm2, %v742_v17  ;;  %v897_v23 = vpop.f32.mrf.mxu0  ;;  %v728_v29 = vpop.f32.mrf.mxu1 }
  0xd7   :  { %426 = vrot.lane.b32.xlu1 %v702_v16, %s745_s18  ;;  %358 = vrot.lane.b32.xlu0 %v119_v18, %s743_s28  ;;  %283 = vst.msk [vmem:[%s1524_s3 + $0x38] sm:$0xff] %vm267_vm1, %v897_v23  ;;  %273 = vst.msk [vmem:[%s1525_s4 + $0x28] sm:$0xff] %vm267_vm1, %v728_v29 }
  0xd8   :  { %531 = vst.msk [vmem:[%s1524_s3 + $0x38] sm:$0xff] %vm523_vm2, %v742_v17  ;;  %v911_v24 = vpop.f32.mrf.mxu0  ;;  %v248_v30 = vpop.f32.mrf.mxu1 }
  0xd9   :  { %282 = vst.msk [vmem:[%s1524_s3 + $0x30] sm:$0xff] %vm267_vm1, %v911_v24  ;;  %272 = vst.msk [vmem:[%s1525_s4 + $0x20] sm:$0xff] %vm267_vm1, %v248_v30 }
  0xda   :  { %530 = vst.msk [vmem:[%s1524_s3 + $0x30] sm:$0xff] %vm523_vm2, %v742_v17  ;;  %v731_v31 = vpop.f32.mrf.mxu1 }
  0xdb   :  { %459 = vrot.lane.b32.xlu1 %v702_v16, %s746_s29  ;;  %391 = vrot.lane.b32.xlu0 %v119_v18, %s744_s10  ;;  %275 = vst.msk [vmem:[%s1525_s4 + $0x38] sm:$0xff] %vm267_vm1, %v731_v31 }
  0xdc   :  { %v258_v32 = vpop.f32.mrf.mxu1 }
  0xdd   :  { %274 = vst.msk [vmem:[%s1525_s4 + $0x30] sm:$0xff] %vm267_vm1, %v258_v32 }
  0xdf   :  { %492 = vrot.lane.b32.xlu1 %v702_v16, %s747_s30  ;;  %424 = vrot.lane.b32.xlu0 %v119_v18, %s745_s18 }
  0xe3   :  { %457 = vrot.lane.b32.xlu0 %v119_v18, %s746_s29  ;;  %298 = vrot.lane.b32.xlu1 %v705_v19, %s741_s21 }
  0xe7   :  { %490 = vrot.lane.b32.xlu0 %v119_v18, %s747_s30  ;;  %331 = vrot.lane.b32.xlu1 %v705_v19, %s740_s20 }
  0xeb   :  { %364 = vrot.lane.b32.xlu1 %v705_v19, %s743_s28  ;;  %329 = vrot.lane.b32.xlu0 %v129_v20, %s740_s20 }
  0xef   :  { %397 = vrot.lane.b32.xlu1 %v705_v19, %s744_s10  ;;  %362 = vrot.lane.b32.xlu0 %v129_v20, %s743_s28 }
  0xf3   :  { %430 = vrot.lane.b32.xlu1 %v705_v19, %s745_s18  ;;  %395 = vrot.lane.b32.xlu0 %v129_v20, %s744_s10 }
  0xf7   :  { %463 = vrot.lane.b32.xlu1 %v705_v19, %s746_s29  ;;  %428 = vrot.lane.b32.xlu0 %v129_v20, %s745_s18 }
  0xfb   :  { %496 = vrot.lane.b32.xlu1 %v705_v19, %s747_s30  ;;  %461 = vrot.lane.b32.xlu0 %v129_v20, %s746_s29 }
  0xff   :  { %494 = vrot.lane.b32.xlu0 %v129_v20, %s747_s30  ;;  %296 = vrot.lane.b32.xlu1 %v129_v20, %s741_s21 }
 0x103   :  { %302 = vrot.lane.b32.xlu1 %v708_v21, %s741_s21  ;;  %300 = vrot.lane.b32.xlu0 %v139_v22, %s741_s21 }
 0x107   :  { %335 = vrot.lane.b32.xlu1 %v708_v21, %s740_s20  ;;  %333 = vrot.lane.b32.xlu0 %v139_v22, %s740_s20 }
 0x10b   :  { %368 = vrot.lane.b32.xlu1 %v708_v21, %s743_s28  ;;  %366 = vrot.lane.b32.xlu0 %v139_v22, %s743_s28 }
 0x10f   :  { %401 = vrot.lane.b32.xlu1 %v708_v21, %s744_s10  ;;  %399 = vrot.lane.b32.xlu0 %v139_v22, %s744_s10 }
 0x113   :  { %434 = vrot.lane.b32.xlu1 %v708_v21, %s745_s18  ;;  %432 = vrot.lane.b32.xlu0 %v139_v22, %s745_s18 }
 0x117   :  { %467 = vrot.lane.b32.xlu1 %v708_v21, %s746_s29  ;;  %465 = vrot.lane.b32.xlu0 %v139_v22, %s746_s29 }
 0x11b   :  { %500 = vrot.lane.b32.xlu1 %v708_v21, %s747_s30  ;;  %498 = vrot.lane.b32.xlu0 %v139_v22, %s747_s30 }
 0x11f   :  { %306 = vrot.lane.b32.xlu1 %v897_v23, %s741_s21  ;;  %304 = vrot.lane.b32.xlu0 %v911_v24, %s741_s21 }
 0x123   :  { %339 = vrot.lane.b32.xlu1 %v897_v23, %s740_s20  ;;  %337 = vrot.lane.b32.xlu0 %v911_v24, %s740_s20 }
 0x127   :  { %372 = vrot.lane.b32.xlu1 %v897_v23, %s743_s28  ;;  %370 = vrot.lane.b32.xlu0 %v911_v24, %s743_s28 }
 0x12b   :  { %405 = vrot.lane.b32.xlu1 %v897_v23, %s744_s10  ;;  %403 = vrot.lane.b32.xlu0 %v911_v24, %s744_s10 }
 0x12f   :  { %438 = vrot.lane.b32.xlu1 %v897_v23, %s745_s18  ;;  %436 = vrot.lane.b32.xlu0 %v911_v24, %s745_s18 }
 0x133   :  { %471 = vrot.lane.b32.xlu1 %v897_v23, %s746_s29  ;;  %469 = vrot.lane.b32.xlu0 %v911_v24, %s746_s29 }
 0x137   :  { %504 = vrot.lane.b32.xlu1 %v897_v23, %s747_s30  ;;  %502 = vrot.lane.b32.xlu0 %v911_v24, %s747_s30 }
 0x13d   :  { %v328_v33 = vpop.permute.xlu1 %327  ;;  %v295_v34 = vpop.permute.xlu0 %294 }
 0x13e   :  { %621 = vst.msk [vmem:[%s1524_s3 + $0x88] sm:$0xff] %vm267_vm1, %v328_v33  ;;  %613 = vst.msk [vmem:[%s1524_s3 + $0x48] sm:$0xff] %vm267_vm1, %v295_v34 }
 0x13f   :  { %541 = vst.msk [vmem:[%s1524_s3 + $0x88] sm:$0xff] %vm523_vm2, %v742_v17  ;;  %533 = vst.msk [vmem:[%s1524_s3 + $0x48] sm:$0xff] %vm523_vm2, %v742_v17 }
 0x141   :  { %v361_v35 = vpop.permute.xlu1 %360  ;;  %v293_v36 = vpop.permute.xlu0 %292 }
 0x142   :  { %629 = vst.msk [vmem:[%s1524_s3 + $0xc8] sm:$0xff] %vm267_vm1, %v361_v35  ;;  %612 = vst.msk [vmem:[%s1524_s3 + $0x40] sm:$0xff] %vm267_vm1, %v293_v36 }
 0x143   :  { %549 = vst.msk [vmem:[%s1524_s3 + $0xc8] sm:$0xff] %vm523_vm2, %v742_v17  ;;  %532 = vst.msk [vmem:[%s1524_s3 + $0x40] sm:$0xff] %vm523_vm2, %v742_v17 }
 0x145   :  { %v394_v37 = vpop.permute.xlu1 %393  ;;  %v326_v38 = vpop.permute.xlu0 %325 }
 0x146   :  { %637 = vst.msk [vmem:[%s1524_s3 + $0x108] sm:$0xff] %vm267_vm1, %v394_v37  ;;  %620 = vst.msk [vmem:[%s1524_s3 + $0x80] sm:$0xff] %vm267_vm1, %v326_v38 }
 0x147   :  { %557 = vst.msk [vmem:[%s1524_s3 + $0x108] sm:$0xff] %vm523_vm2, %v742_v17  ;;  %540 = vst.msk [vmem:[%s1524_s3 + $0x80] sm:$0xff] %vm523_vm2, %v742_v17 }
 0x149   :  { %v427_v39 = vpop.permute.xlu1 %426  ;;  %v359_v40 = vpop.permute.xlu0 %358 }
 0x14a   :  { %645 = vst.msk [vmem:[%s1524_s3 + $0x148] sm:$0xff] %vm267_vm1, %v427_v39  ;;  %628 = vst.msk [vmem:[%s1524_s3 + $0xc0] sm:$0xff] %vm267_vm1, %v359_v40 }
 0x14b   :  { %565 = vst.msk [vmem:[%s1524_s3 + $0x148] sm:$0xff] %vm523_vm2, %v742_v17  ;;  %548 = vst.msk [vmem:[%s1524_s3 + $0xc0] sm:$0xff] %vm523_vm2, %v742_v17 }
 0x14d   :  { %v460_v41 = vpop.permute.xlu1 %459  ;;  %v392_v42 = vpop.permute.xlu0 %391 }
 0x14e   :  { %653 = vst.msk [vmem:[%s1524_s3 + $0x188] sm:$0xff] %vm267_vm1, %v460_v41  ;;  %636 = vst.msk [vmem:[%s1524_s3 + $0x100] sm:$0xff] %vm267_vm1, %v392_v42 }
 0x14f   :  { %573 = vst.msk [vmem:[%s1524_s3 + $0x188] sm:$0xff] %vm523_vm2, %v742_v17  ;;  %556 = vst.msk [vmem:[%s1524_s3 + $0x100] sm:$0xff] %vm523_vm2, %v742_v17 }
 0x151   :  { %v493_v43 = vpop.permute.xlu1 %492  ;;  %v425_v44 = vpop.permute.xlu0 %424 }
 0x152   :  { %661 = vst.msk [vmem:[%s1524_s3 + $0x1c8] sm:$0xff] %vm267_vm1, %v493_v43  ;;  %644 = vst.msk [vmem:[%s1524_s3 + $0x140] sm:$0xff] %vm267_vm1, %v425_v44 }
 0x153   :  { %581 = vst.msk [vmem:[%s1524_s3 + $0x1c8] sm:$0xff] %vm523_vm2, %v742_v17  ;;  %564 = vst.msk [vmem:[%s1524_s3 + $0x140] sm:$0xff] %vm523_vm2, %v742_v17 }
 0x155   :  { %v458_v45 = vpop.permute.xlu0 %457  ;;  %v299_v46 = vpop.permute.xlu1 %298 }
 0x156   :  { %652 = vst.msk [vmem:[%s1524_s3 + $0x180] sm:$0xff] %vm267_vm1, %v458_v45  ;;  %615 = vst.msk [vmem:[%s1524_s3 + $0x58] sm:$0xff] %vm267_vm1, %v299_v46 }
 0x157   :  { %572 = vst.msk [vmem:[%s1524_s3 + $0x180] sm:$0xff] %vm523_vm2, %v742_v17  ;;  %535 = vst.msk [vmem:[%s1524_s3 + $0x58] sm:$0xff] %vm523_vm2, %v742_v17 }
 0x159   :  { %v491_v47 = vpop.permute.xlu0 %490  ;;  %v332_v48 = vpop.permute.xlu1 %331 }
 0x15a   :  { %660 = vst.msk [vmem:[%s1524_s3 + $0x1c0] sm:$0xff] %vm267_vm1, %v491_v47  ;;  %623 = vst.msk [vmem:[%s1524_s3 + $0x98] sm:$0xff] %vm267_vm1, %v332_v48 }
 0x15b   :  { %580 = vst.msk [vmem:[%s1524_s3 + $0x1c0] sm:$0xff] %vm523_vm2, %v742_v17  ;;  %543 = vst.msk [vmem:[%s1524_s3 + $0x98] sm:$0xff] %vm523_vm2, %v742_v17 }
 0x15d   :  { %v365_v49 = vpop.permute.xlu1 %364  ;;  %v330_v50 = vpop.permute.xlu0 %329 }
 0x15e   :  { %631 = vst.msk [vmem:[%s1524_s3 + $0xd8] sm:$0xff] %vm267_vm1, %v365_v49  ;;  %622 = vst.msk [vmem:[%s1524_s3 + $0x90] sm:$0xff] %vm267_vm1, %v330_v50 }
 0x15f   :  { %551 = vst.msk [vmem:[%s1524_s3 + $0xd8] sm:$0xff] %vm523_vm2, %v742_v17  ;;  %542 = vst.msk [vmem:[%s1524_s3 + $0x90] sm:$0xff] %vm523_vm2, %v742_v17 }
 0x161   :  { %v398_v51 = vpop.permute.xlu1 %397  ;;  %v363_v52 = vpop.permute.xlu0 %362 }
 0x162   :  { %639 = vst.msk [vmem:[%s1524_s3 + $0x118] sm:$0xff] %vm267_vm1, %v398_v51  ;;  %630 = vst.msk [vmem:[%s1524_s3 + $0xd0] sm:$0xff] %vm267_vm1, %v363_v52 }
 0x163   :  { %559 = vst.msk [vmem:[%s1524_s3 + $0x118] sm:$0xff] %vm523_vm2, %v742_v17  ;;  %550 = vst.msk [vmem:[%s1524_s3 + $0xd0] sm:$0xff] %vm523_vm2, %v742_v17 }
 0x165   :  { %v431_v53 = vpop.permute.xlu1 %430  ;;  %v396_v54 = vpop.permute.xlu0 %395 }
 0x166   :  { %647 = vst.msk [vmem:[%s1524_s3 + $0x158] sm:$0xff] %vm267_vm1, %v431_v53  ;;  %638 = vst.msk [vmem:[%s1524_s3 + $0x110] sm:$0xff] %vm267_vm1, %v396_v54 }
 0x167   :  { %567 = vst.msk [vmem:[%s1524_s3 + $0x158] sm:$0xff] %vm523_vm2, %v742_v17  ;;  %558 = vst.msk [vmem:[%s1524_s3 + $0x110] sm:$0xff] %vm523_vm2, %v742_v17 }
 0x169   :  { %v464_v55 = vpop.permute.xlu1 %463  ;;  %v429_v56 = vpop.permute.xlu0 %428 }
 0x16a   :  { %655 = vst.msk [vmem:[%s1524_s3 + $0x198] sm:$0xff] %vm267_vm1, %v464_v55  ;;  %646 = vst.msk [vmem:[%s1524_s3 + $0x150] sm:$0xff] %vm267_vm1, %v429_v56 }
 0x16b   :  { %575 = vst.msk [vmem:[%s1524_s3 + $0x198] sm:$0xff] %vm523_vm2, %v742_v17  ;;  %566 = vst.msk [vmem:[%s1524_s3 + $0x150] sm:$0xff] %vm523_vm2, %v742_v17 }
 0x16d   :  { %v497_v57 = vpop.permute.xlu1 %496  ;;  %v462_v58 = vpop.permute.xlu0 %461 }
 0x16e   :  { %663 = vst.msk [vmem:[%s1524_s3 + $0x1d8] sm:$0xff] %vm267_vm1, %v497_v57  ;;  %654 = vst.msk [vmem:[%s1524_s3 + $0x190] sm:$0xff] %vm267_vm1, %v462_v58 }
 0x16f   :  { %583 = vst.msk [vmem:[%s1524_s3 + $0x1d8] sm:$0xff] %vm523_vm2, %v742_v17  ;;  %574 = vst.msk [vmem:[%s1524_s3 + $0x190] sm:$0xff] %vm523_vm2, %v742_v17 }
 0x171   :  { %v495_v59 = vpop.permute.xlu0 %494  ;;  %v297_v60 = vpop.permute.xlu1 %296 }
 0x172   :  { %662 = vst.msk [vmem:[%s1524_s3 + $0x1d0] sm:$0xff] %vm267_vm1, %v495_v59  ;;  %614 = vst.msk [vmem:[%s1524_s3 + $0x50] sm:$0xff] %vm267_vm1, %v297_v60 }
 0x173   :  { %582 = vst.msk [vmem:[%s1524_s3 + $0x1d0] sm:$0xff] %vm523_vm2, %v742_v17  ;;  %534 = vst.msk [vmem:[%s1524_s3 + $0x50] sm:$0xff] %vm523_vm2, %v742_v17 }
 0x175   :  { %v303_v61 = vpop.permute.xlu1 %302  ;;  %v301_v62 = vpop.permute.xlu0 %300 }
 0x176   :  { %617 = vst.msk [vmem:[%s1524_s3 + $0x68] sm:$0xff] %vm267_vm1, %v303_v61  ;;  %616 = vst.msk [vmem:[%s1524_s3 + $0x60] sm:$0xff] %vm267_vm1, %v301_v62 }
 0x177   :  { %537 = vst.msk [vmem:[%s1524_s3 + $0x68] sm:$0xff] %vm523_vm2, %v742_v17  ;;  %536 = vst.msk [vmem:[%s1524_s3 + $0x60] sm:$0xff] %vm523_vm2, %v742_v17 }
 0x179   :  { %v336_v63 = vpop.permute.xlu1 %335  ;;  %v334_v0 = vpop.permute.xlu0 %333 }
 0x17a   :  { %625 = vst.msk [vmem:[%s1524_s3 + $0xa8] sm:$0xff] %vm267_vm1, %v336_v63  ;;  %624 = vst.msk [vmem:[%s1524_s3 + $0xa0] sm:$0xff] %vm267_vm1, %v334_v0 }
 0x17b   :  { %545 = vst.msk [vmem:[%s1524_s3 + $0xa8] sm:$0xff] %vm523_vm2, %v742_v17  ;;  %544 = vst.msk [vmem:[%s1524_s3 + $0xa0] sm:$0xff] %vm523_vm2, %v742_v17 }
 0x17d   :  { %v369_v1 = vpop.permute.xlu1 %368  ;;  %v367_v2 = vpop.permute.xlu0 %366 }
 0x17e   :  { %633 = vst.msk [vmem:[%s1524_s3 + $0xe8] sm:$0xff] %vm267_vm1, %v369_v1  ;;  %632 = vst.msk [vmem:[%s1524_s3 + $0xe0] sm:$0xff] %vm267_vm1, %v367_v2 }
 0x17f   :  { %553 = vst.msk [vmem:[%s1524_s3 + $0xe8] sm:$0xff] %vm523_vm2, %v742_v17  ;;  %552 = vst.msk [vmem:[%s1524_s3 + $0xe0] sm:$0xff] %vm523_vm2, %v742_v17 }
 0x181   :  { %v402_v3 = vpop.permute.xlu1 %401  ;;  %v400_v4 = vpop.permute.xlu0 %399 }
 0x182   :  { %641 = vst.msk [vmem:[%s1524_s3 + $0x128] sm:$0xff] %vm267_vm1, %v402_v3  ;;  %640 = vst.msk [vmem:[%s1524_s3 + $0x120] sm:$0xff] %vm267_vm1, %v400_v4 }
 0x183   :  { %561 = vst.msk [vmem:[%s1524_s3 + $0x128] sm:$0xff] %vm523_vm2, %v742_v17  ;;  %560 = vst.msk [vmem:[%s1524_s3 + $0x120] sm:$0xff] %vm523_vm2, %v742_v17 }
 0x185   :  { %v435_v5 = vpop.permute.xlu1 %434  ;;  %v433_v6 = vpop.permute.xlu0 %432 }
 0x186   :  { %649 = vst.msk [vmem:[%s1524_s3 + $0x168] sm:$0xff] %vm267_vm1, %v435_v5  ;;  %648 = vst.msk [vmem:[%s1524_s3 + $0x160] sm:$0xff] %vm267_vm1, %v433_v6 }
 0x187   :  { %569 = vst.msk [vmem:[%s1524_s3 + $0x168] sm:$0xff] %vm523_vm2, %v742_v17  ;;  %568 = vst.msk [vmem:[%s1524_s3 + $0x160] sm:$0xff] %vm523_vm2, %v742_v17 }
 0x189   :  { %v468_v7 = vpop.permute.xlu1 %467  ;;  %v466_v8 = vpop.permute.xlu0 %465 }
 0x18a   :  { %657 = vst.msk [vmem:[%s1524_s3 + $0x1a8] sm:$0xff] %vm267_vm1, %v468_v7  ;;  %656 = vst.msk [vmem:[%s1524_s3 + $0x1a0] sm:$0xff] %vm267_vm1, %v466_v8 }
 0x18b   :  { %577 = vst.msk [vmem:[%s1524_s3 + $0x1a8] sm:$0xff] %vm523_vm2, %v742_v17  ;;  %576 = vst.msk [vmem:[%s1524_s3 + $0x1a0] sm:$0xff] %vm523_vm2, %v742_v17 }
 0x18d   :  { %v501_v9 = vpop.permute.xlu1 %500  ;;  %v499_v10 = vpop.permute.xlu0 %498 }
 0x18e   :  { %665 = vst.msk [vmem:[%s1524_s3 + $0x1e8] sm:$0xff] %vm267_vm1, %v501_v9  ;;  %664 = vst.msk [vmem:[%s1524_s3 + $0x1e0] sm:$0xff] %vm267_vm1, %v499_v10 }
 0x18f   :  { %585 = vst.msk [vmem:[%s1524_s3 + $0x1e8] sm:$0xff] %vm523_vm2, %v742_v17  ;;  %584 = vst.msk [vmem:[%s1524_s3 + $0x1e0] sm:$0xff] %vm523_vm2, %v742_v17 }
 0x191   :  { %v307_v11 = vpop.permute.xlu1 %306  ;;  %v305_v12 = vpop.permute.xlu0 %304 }
 0x192   :  { %619 = vst.msk [vmem:[%s1524_s3 + $0x78] sm:$0xff] %vm267_vm1, %v307_v11  ;;  %618 = vst.msk [vmem:[%s1524_s3 + $0x70] sm:$0xff] %vm267_vm1, %v305_v12 }
 0x193   :  { %539 = vst.msk [vmem:[%s1524_s3 + $0x78] sm:$0xff] %vm523_vm2, %v742_v17  ;;  %538 = vst.msk [vmem:[%s1524_s3 + $0x70] sm:$0xff] %vm523_vm2, %v742_v17 }
 0x195   :  { %v340_v13 = vpop.permute.xlu1 %339  ;;  %v338_v14 = vpop.permute.xlu0 %337 }
 0x196   :  { %627 = vst.msk [vmem:[%s1524_s3 + $0xb8] sm:$0xff] %vm267_vm1, %v340_v13  ;;  %626 = vst.msk [vmem:[%s1524_s3 + $0xb0] sm:$0xff] %vm267_vm1, %v338_v14 }
 0x197   :  { %547 = vst.msk [vmem:[%s1524_s3 + $0xb8] sm:$0xff] %vm523_vm2, %v742_v17  ;;  %546 = vst.msk [vmem:[%s1524_s3 + $0xb0] sm:$0xff] %vm523_vm2, %v742_v17 }
 0x199   :  { %v373_v15 = vpop.permute.xlu1 %372  ;;  %v371_v16 = vpop.permute.xlu0 %370 }
 0x19a   :  { %635 = vst.msk [vmem:[%s1524_s3 + $0xf8] sm:$0xff] %vm267_vm1, %v373_v15  ;;  %634 = vst.msk [vmem:[%s1524_s3 + $0xf0] sm:$0xff] %vm267_vm1, %v371_v16 }
 0x19b   :  { %555 = vst.msk [vmem:[%s1524_s3 + $0xf8] sm:$0xff] %vm523_vm2, %v742_v17  ;;  %554 = vst.msk [vmem:[%s1524_s3 + $0xf0] sm:$0xff] %vm523_vm2, %v742_v17 }
 0x19d   :  { %v406_v18 = vpop.permute.xlu1 %405  ;;  %v404_v19 = vpop.permute.xlu0 %403 }
 0x19e   :  { %643 = vst.msk [vmem:[%s1524_s3 + $0x138] sm:$0xff] %vm267_vm1, %v406_v18  ;;  %642 = vst.msk [vmem:[%s1524_s3 + $0x130] sm:$0xff] %vm267_vm1, %v404_v19 }
 0x19f   :  { %563 = vst.msk [vmem:[%s1524_s3 + $0x138] sm:$0xff] %vm523_vm2, %v742_v17  ;;  %562 = vst.msk [vmem:[%s1524_s3 + $0x130] sm:$0xff] %vm523_vm2, %v742_v17 }
 0x1a1   :  { %v439_v20 = vpop.permute.xlu1 %438  ;;  %v437_v21 = vpop.permute.xlu0 %436 }
 0x1a2   :  { %651 = vst.msk [vmem:[%s1524_s3 + $0x178] sm:$0xff] %vm267_vm1, %v439_v20  ;;  %650 = vst.msk [vmem:[%s1524_s3 + $0x170] sm:$0xff] %vm267_vm1, %v437_v21 }
 0x1a3   :  { %571 = vst.msk [vmem:[%s1524_s3 + $0x178] sm:$0xff] %vm523_vm2, %v742_v17  ;;  %570 = vst.msk [vmem:[%s1524_s3 + $0x170] sm:$0xff] %vm523_vm2, %v742_v17 }
 0x1a5   :  { %v472_v22 = vpop.permute.xlu1 %471  ;;  %v470_v23 = vpop.permute.xlu0 %469 }
 0x1a6   :  { %659 = vst.msk [vmem:[%s1524_s3 + $0x1b8] sm:$0xff] %vm267_vm1, %v472_v22  ;;  %658 = vst.msk [vmem:[%s1524_s3 + $0x1b0] sm:$0xff] %vm267_vm1, %v470_v23 }
 0x1a7   :  { %579 = vst.msk [vmem:[%s1524_s3 + $0x1b8] sm:$0xff] %vm523_vm2, %v742_v17  ;;  %578 = vst.msk [vmem:[%s1524_s3 + $0x1b0] sm:$0xff] %vm523_vm2, %v742_v17 }
 0x1a9   :  { %v505_v24 = vpop.permute.xlu1 %504  ;;  %v503_v25 = vpop.permute.xlu0 %502 }
 0x1aa   :  { %667 = vst.msk [vmem:[%s1524_s3 + $0x1f8] sm:$0xff] %vm267_vm1, %v505_v24  ;;  %666 = vst.msk [vmem:[%s1524_s3 + $0x1f0] sm:$0xff] %vm267_vm1, %v503_v25 }
 0x1ab   :  { %587 = vst.msk [vmem:[%s1524_s3 + $0x1f8] sm:$0xff] %vm523_vm2, %v742_v17  ;;  %586 = vst.msk [vmem:[%s1524_s3 + $0x1f0] sm:$0xff] %vm523_vm2, %v742_v17 }

</bundles_post_ra>
